<compile_context>
chip_gen: v5e
topology: v5e:2x2
jax: 0.10.0
libtpu: 0.0.40
codegen_flags: <defaults>
</compile_context>

<pallas_src>
import numpy as np
import jax
import jax.numpy as jnp
from jax import lax
from jax.experimental import pallas as pl
from jax.experimental.pallas import tpu as pltpu


# ------------------------- Fused Pallas kernel --------------------------------
def make_fused_rnn_kernel(T, B, H, L, D):
    """Full L-layer bidirectional tanh RNN in one kernel.  B is the padded batch.

    Refs:
      x_ref    : (T*B, 1)              time-major, batch-padded input (input_size=1)
      wih0_ref : (D, H)                layer-0 input weight rows (one per direction)
      wih1_ref : (max(L-1,1), 2H, 2H)  layer>=1 input weights, [W_f | W_b] per layer
      whh_ref  : (L, 2H, 2H)           block-diagonal recurrent weights per layer
      b_ref    : (L, 2H)               fused biases [b_ih_f+b_hh_f | b_ih_b+b_hh_b]
      h0_ref   : (L, B, 2H)            fused initial hidden states [h_f | h_b]
      out_ref  : (B, T*2H)             lane-dense last-layer outputs
      hT_ref   : (L, B, 2H)            fused final hidden states
      actf_ref : (T*B, H)  scratch     time-aligned forward activations (layer l-1)
      actb_ref : (T*B, H)  scratch     time-aligned backward activations (layer l-1)
    """
    # TODO(synk): unidirectional path (hidden_size == 1 => directions == 1) not implemented.
    assert D == 2
    DH = D * H

    def kernel(x_ref, wih0_ref, wih1_ref, whh_ref, b_ref, h0_ref,
               out_ref, hT_ref, actf_ref, actb_ref):

        def rev_t(a):
            # reverse the T time-blocks of a (T*B, .) slab (static slices, off-chain)
            return jnp.concatenate(
                [a[(T - 1 - s) * B:(T - s) * B] for s in range(T)], axis=0)

        def pair(pf, pb):
            # paired projection slab: row-block s = [proj_fwd[t=s] | proj_bwd[t=T-1-s]]
            return jnp.concatenate([pf, rev_t(pb)], axis=1)

        # ---- layer-0 input projection: VPU broadcasts, hoisted over all T ------
        x = x_ref[...]                                        # (T*B, 1)
        w0 = wih0_ref[...]                                    # (2, H)
        proj = pair(x * w0[0:1, :], x * w0[1:2, :]) + b_ref[0:1, :]   # (T*B, 2H)

        outs = [None] * T
        for l in range(L):
            if l > 0:
                # Fused input projection of layer l: ONE (T*B,2H)@(2H,2H) matmul.
                act = jnp.concatenate([actf_ref[...], actb_ref[...]], axis=1)
                pall = (jnp.dot(act, wih1_ref[l - 1],
                                preferred_element_type=jnp.float32)
                        + b_ref[l:l + 1, :])
                proj = pair(pall[:, 0:H], pall[:, H:DH])

            whh = whh_ref[l]                                  # (2H, 2H) block-diag
            h = h0_ref[l]                                     # (B, 2H) = [h_f | h_b]
            last = (l == L - 1)
            outs = [None] * T
            for s in range(T):
                # one dot + one add + one tanh per serial step (both directions)
                h = jnp.tanh(proj[s * B:(s + 1) * B, :]
                             + jnp.dot(h, whh, preferred_element_type=jnp.float32))
                if last:
                    outs[s] = h
                else:
                    # stream time-aligned halves into VMEM scratch (off the chain)
                    actf_ref[s * B:(s + 1) * B, :] = h[:, 0:H]
                    actb_ref[(T - 1 - s) * B:(T - s) * B, :] = h[:, H:DH]
            hT_ref[l] = h

        # ---- single lane-dense (B, T*2H) output store ---------------------------
        # outs[s] = [h_f[t=s] | h_b[t=T-1-s]]  ->  time t gets [h_f[t] | h_b[t]]
        out_ref[...] = jnp.concatenate(
            [jnp.concatenate([outs[t][:, 0:H], outs[T - 1 - t][:, H:DH]], axis=1)
             for t in range(T)], axis=1)

    return kernel


# ------------------------- Public forward (batch_first semantics) -------------
def tone_net_rnn_forward(x, hn, packed, num_layers, directions, hidden_size):
    """x: (B, T, 1) batch_first, hn: (L*D, B, H) -> (res (B,T,D*H), hn (L*D,B,H))."""
    B, T, _ = x.shape
    L, D, H = num_layers, directions, hidden_size
    DH = D * H
    Bp = ((B + 7) // 8) * 8                 # pad batch to a full sublane group

    # time-major, batch-padded, flattened input (input_size == 1)
    xt = jnp.swapaxes(x, 0, 1)[:, :, 0]                       # (T, B)
    xt = jnp.pad(xt, ((0, 0), (0, Bp - B)))                   # (T, Bp)
    x_flat = xt.reshape(T * Bp, 1)

    # initial hidden states fused per layer: (L*D, B, H) -> (L, Bp, D*H)
    h0 = hn.reshape(L, D, B, H).transpose(0, 2, 1, 3).reshape(L, B, DH)
    h0 = jnp.pad(h0, ((0, 0), (0, Bp - B), (0, 0)))

    vmem = pl.BlockSpec(memory_space=pltpu.MemorySpace.VMEM)
    kernel = make_fused_rnn_kernel(T, Bp, H, L, D)
    out_flat, hT = pl.pallas_call(
        kernel,
        out_shape=(jax.ShapeDtypeStruct((Bp, T * DH), jnp.float32),
                   jax.ShapeDtypeStruct((L, Bp, DH), jnp.float32)),
        in_specs=[vmem] * 6,
        out_specs=(vmem, vmem),
        scratch_shapes=[pltpu.VMEM((T * Bp, H), jnp.float32),
                        pltpu.VMEM((T * Bp, H), jnp.float32)],
    )(x_flat, packed["wih0"], packed["wih1"], packed["whh"], packed["b"], h0)

    res = out_flat[:B].reshape(B, T, DH)                      # strip pad, free reshape
    hT_out = (hT[:, :B].reshape(L, B, D, H)
              .transpose(0, 2, 1, 3).reshape(L * D, B, H))
    return res, hT_out


# ------------------------- Deterministic parameter init -----------------------
def init_params(key, num_layers, directions, hidden_size):
    """PyTorch nn.RNN-style per-(layer, direction) params, pre-transposed for x @ W."""
    L, D, H = num_layers, directions, hidden_size
    bound = 1.0 / np.sqrt(H)
    w_ih, w_hh, b = [], [], []
    for l in range(L):
        in_dim = 1 if l == 0 else D * H
        for _ in range(D):
            key, k1, k2, k3, k4 = jax.random.split(key, 5)
            w_ih.append(jax.random.uniform(k1, (in_dim, H), jnp.float32, -bound, bound))
            w_hh.append(jax.random.uniform(k2, (H, H), jnp.float32, -bound, bound))
            b.append(jax.random.uniform(k3, (H,), jnp.float32, -bound, bound)
                     + jax.random.uniform(k4, (H,), jnp.float32, -bound, bound))
    return {"w_ih": w_ih, "w_hh": w_hh, "b": b}


def pack_params(p, num_layers, directions, hidden_size):
    """Pack per-direction params into the direction-fused layouts the kernel expects."""
    L, D, H = num_layers, directions, hidden_size
    assert D == 2  # TODO(synk): unidirectional packing untested
    DH = D * H
    wih0 = jnp.stack([p["w_ih"][d].reshape(H) for d in range(D)])            # (D, H)
    if L > 1:
        wih1 = jnp.stack(
            [jnp.concatenate([p["w_ih"][l * D + d] for d in range(D)], axis=1)
             for l in range(1, L)])                                           # (L-1, DH, DH)
    else:
        wih1 = jnp.zeros((1, DH, DH), jnp.float32)                            # dummy, never read
    whh = jnp.stack([
        jnp.concatenate([
            jnp.concatenate([p["w_hh"][l * D + d] if dd == d
                             else jnp.zeros((H, H), jnp.float32)
                             for dd in range(D)], axis=1)
            for d in range(D)], axis=0)
        for l in range(L)])                                                   # (L, DH, DH)
    b = jnp.stack([jnp.concatenate([p["b"][l * D + d] for d in range(D)])
                   for l in range(L)])                                        # (L, DH)
    return {"wih0": wih0, "wih1": wih1, "whh": whh, "b": b}


# ------------------------- Pure-JAX reference (for verification) --------------
def rnn_ref(x, hn, p, num_layers, directions, hidden_size):
    B, T, _ = x.shape
    L, D, H = num_layers, directions, hidden_size
    layer_in = jnp.swapaxes(x, 0, 1)                          # (T, B, F)
    hT_list = []
    for l in range(L):
        outs = []
        for d in range(D):
            idx = l * D + d
            proj = jnp.einsum("tbf,fh->tbh", layer_in, p["w_ih"][idx]) + p["b"][idx]
            whh = p["w_hh"][idx]
            xs = proj if d == 0 else proj[::-1]

            def step(h, pt, whh=whh):
                h_new = jnp.tanh(pt + h @ whh)
                return h_new, h_new

            hT, ys = lax.scan(step, hn[idx], xs)
            if d == 1:
                ys = ys[::-1]
            outs.append(ys)
            hT_list.append(hT)
        layer_in = jnp.concatenate(outs, axis=-1)
    return jnp.swapaxes(layer_in, 0, 1), jnp.stack(hT_list, 0)


# ------------------------- Main -----------------------------------------------
if __name__ == "__main__":
    # ToneNet_RNN((num_layers, hidden_size)): hidden_size > 1 => bidirectional
    num_layers = 2
    hidden_size = 32
    directions = 2 if hidden_size > 1 else 1
    B, T = 2, 8

    key = jax.random.PRNGKey(0)
    k_x, k_h, k_p = jax.random.split(key, 3)
    x = jax.random.normal(k_x, (B, T, 1), jnp.float32)                         # batch_first input
    hn = jax.random.normal(k_h, (num_layers * directions, B, hidden_size), jnp.float32)
    params = init_params(k_p, num_layers, directions, hidden_size)
    packed = pack_params(params, num_layers, directions, hidden_size)

    fwd = jax.jit(tone_net_rnn_forward, static_argnums=(3, 4, 5))
    res, hn_out = fwd(x, hn, packed, num_layers, directions, hidden_size)
    res = jax.block_until_ready(res)
    hn_out = jax.block_until_ready(hn_out)

    assert res.shape == (B, T, directions * hidden_size)
    assert hn_out.shape == (num_layers * directions, B, hidden_size)

    # verify against a pure-JAX reference
    res_ref, hn_ref = rnn_ref(x, hn, params, num_layers, directions, hidden_size)
    np.testing.assert_allclose(np.asarray(res), np.asarray(res_ref), atol=1e-5, rtol=1e-5)
    np.testing.assert_allclose(np.asarray(hn_out), np.asarray(hn_ref), atol=1e-5, rtol=1e-5)

    print("KERNEL_OK")
</pallas_src>

<mosaic_0001>
module attributes {stable_mosaic.version = 11 : i64} {
  func.func @kernel(%arg0: memref<64x1xf32, #tpu.memory_space<vmem>>, %arg1: memref<2x32xf32, #tpu.memory_space<vmem>>, %arg2: memref<1x64x64xf32, #tpu.memory_space<vmem>>, %arg3: memref<2x64x64xf32, #tpu.memory_space<vmem>>, %arg4: memref<2x64xf32, #tpu.memory_space<vmem>>, %arg5: memref<2x8x64xf32, #tpu.memory_space<vmem>>, %arg6: memref<8x512xf32, #tpu.memory_space<vmem>>, %arg7: memref<2x8x64xf32, #tpu.memory_space<vmem>>, %arg8: memref<64x32xf32, #tpu.memory_space<vmem>>, %arg9: memref<64x32xf32, #tpu.memory_space<vmem>>) attributes {dimension_semantics = [], scalar_prefetch = 0 : i64, scratch_operands = 2 : i64, tpu.core_type = #tpu.core_type<tc>} {
    %c0 = arith.constant 0 : index
    %c0_0 = arith.constant 0 : index
    %0 = vector.load %arg0[%c0, %c0_0] : memref<64x1xf32, #tpu.memory_space<vmem>>, vector<64x1xf32>
    %c0_1 = arith.constant 0 : index
    %c0_2 = arith.constant 0 : index
    %1 = vector.load %arg1[%c0_1, %c0_2] : memref<2x32xf32, #tpu.memory_space<vmem>>, vector<2x32xf32>
    %2 = vector.extract_strided_slice %1 {offsets = [0, 0], sizes = [1, 32], strides = [1, 1]} : vector<2x32xf32> to vector<1x32xf32>
    %3 = vector.broadcast %0 : vector<64x1xf32> to vector<64x32xf32>
    %4 = vector.broadcast %2 : vector<1x32xf32> to vector<64x32xf32>
    %5 = arith.mulf %3, %4 : vector<64x32xf32>
    %6 = vector.extract_strided_slice %1 {offsets = [1, 0], sizes = [1, 32], strides = [1, 1]} : vector<2x32xf32> to vector<1x32xf32>
    %7 = vector.broadcast %0 : vector<64x1xf32> to vector<64x32xf32>
    %8 = vector.broadcast %6 : vector<1x32xf32> to vector<64x32xf32>
    %9 = arith.mulf %7, %8 : vector<64x32xf32>
    %10 = vector.extract_strided_slice %9 {offsets = [56, 0], sizes = [8, 32], strides = [1, 1]} : vector<64x32xf32> to vector<8x32xf32>
    %11 = vector.extract_strided_slice %9 {offsets = [48, 0], sizes = [8, 32], strides = [1, 1]} : vector<64x32xf32> to vector<8x32xf32>
    %12 = vector.extract_strided_slice %9 {offsets = [40, 0], sizes = [8, 32], strides = [1, 1]} : vector<64x32xf32> to vector<8x32xf32>
    %13 = vector.extract_strided_slice %9 {offsets = [32, 0], sizes = [8, 32], strides = [1, 1]} : vector<64x32xf32> to vector<8x32xf32>
    %14 = vector.extract_strided_slice %9 {offsets = [24, 0], sizes = [8, 32], strides = [1, 1]} : vector<64x32xf32> to vector<8x32xf32>
    %15 = vector.extract_strided_slice %9 {offsets = [16, 0], sizes = [8, 32], strides = [1, 1]} : vector<64x32xf32> to vector<8x32xf32>
    %16 = vector.extract_strided_slice %9 {offsets = [8, 0], sizes = [8, 32], strides = [1, 1]} : vector<64x32xf32> to vector<8x32xf32>
    %17 = vector.extract_strided_slice %9 {offsets = [0, 0], sizes = [8, 32], strides = [1, 1]} : vector<64x32xf32> to vector<8x32xf32>
    %18 = tpu.concatenate %10, %11, %12, %13, %14, %15, %16, %17 in 0 : vector<8x32xf32>, vector<8x32xf32>, vector<8x32xf32>, vector<8x32xf32>, vector<8x32xf32>, vector<8x32xf32>, vector<8x32xf32>, vector<8x32xf32> -> vector<64x32xf32>
    %19 = tpu.concatenate %5, %18 in 1 : vector<64x32xf32>, vector<64x32xf32> -> vector<64x64xf32>
    %c0_3 = arith.constant 0 : index
    %c0_4 = arith.constant 0 : index
    %20 = vector.load %arg4[%c0_3, %c0_4] : memref<2x64xf32, #tpu.memory_space<vmem>>, vector<1x64xf32>
    %21 = vector.broadcast %20 : vector<1x64xf32> to vector<64x64xf32>
    %22 = arith.addf %19, %21 : vector<64x64xf32>
    %c0_5 = arith.constant 0 : index
    %c0_6 = arith.constant 0 : index
    %c0_7 = arith.constant 0 : index
    %23 = vector.load %arg3[%c0_5, %c0_6, %c0_7] : memref<2x64x64xf32, #tpu.memory_space<vmem>>, vector<1x64x64xf32>
    %24 = vector.shape_cast %23 : vector<1x64x64xf32> to vector<64x64xf32>
    %c0_8 = arith.constant 0 : index
    %c0_9 = arith.constant 0 : index
    %c0_10 = arith.constant 0 : index
    %25 = vector.load %arg5[%c0_8, %c0_9, %c0_10] : memref<2x8x64xf32, #tpu.memory_space<vmem>>, vector<1x8x64xf32>
    %26 = vector.shape_cast %25 : vector<1x8x64xf32> to vector<8x64xf32>
    %27 = vector.extract_strided_slice %22 {offsets = [0, 0], sizes = [8, 64], strides = [1, 1]} : vector<64x64xf32> to vector<8x64xf32>
    %cst = arith.constant dense<0.000000e+00> : vector<8x64xf32>
    %28 = tpu.matmul %26, %24, %cst {dimension_numbers = #tpu.dot_dimension_numbers<[1], [0], [0], [1], [0, 0, 1, 1], [], []>} : vector<8x64xf32>, vector<64x64xf32>, vector<8x64xf32> -> vector<8x64xf32>
    %29 = arith.addf %27, %28 : vector<8x64xf32>
    %30 = math.tanh %29 : vector<8x64xf32>
    %31 = vector.extract_strided_slice %30 {offsets = [0, 0], sizes = [8, 32], strides = [1, 1]} : vector<8x64xf32> to vector<8x32xf32>
    %c0_11 = arith.constant 0 : index
    %c0_12 = arith.constant 0 : index
    %32 = vector.load %arg8[%c0_11, %c0_12] : memref<64x32xf32, #tpu.memory_space<vmem>>, vector<8x32xf32>
    tpu.vector_store %arg8[%c0_11, %c0_12], %31 {strides = array<i32>} : memref<64x32xf32, #tpu.memory_space<vmem>>, vector<8x32xf32>,
    %33 = vector.extract_strided_slice %30 {offsets = [0, 32], sizes = [8, 32], strides = [1, 1]} : vector<8x64xf32> to vector<8x32xf32>
    %c56 = arith.constant 56 : index
    %c0_13 = arith.constant 0 : index
    %34 = vector.load %arg9[%c56, %c0_13] : memref<64x32xf32, #tpu.memory_space<vmem>>, vector<8x32xf32>
    tpu.vector_store %arg9[%c56, %c0_13], %33 {strides = array<i32>} : memref<64x32xf32, #tpu.memory_space<vmem>>, vector<8x32xf32>,
    %35 = vector.extract_strided_slice %22 {offsets = [8, 0], sizes = [8, 64], strides = [1, 1]} : vector<64x64xf32> to vector<8x64xf32>
    %cst_14 = arith.constant dense<0.000000e+00> : vector<8x64xf32>
    %36 = tpu.matmul %30, %24, %cst_14 {dimension_numbers = #tpu.dot_dimension_numbers<[1], [0], [0], [1], [0, 0, 1, 1], [], []>} : vector<8x64xf32>, vector<64x64xf32>, vector<8x64xf32> -> vector<8x64xf32>
    %37 = arith.addf %35, %36 : vector<8x64xf32>
    %38 = math.tanh %37 : vector<8x64xf32>
    %39 = vector.extract_strided_slice %38 {offsets = [0, 0], sizes = [8, 32], strides = [1, 1]} : vector<8x64xf32> to vector<8x32xf32>
    %c8 = arith.constant 8 : index
    %c0_15 = arith.constant 0 : index
    %40 = vector.load %arg8[%c8, %c0_15] : memref<64x32xf32, #tpu.memory_space<vmem>>, vector<8x32xf32>
    tpu.vector_store %arg8[%c8, %c0_15], %39 {strides = array<i32>} : memref<64x32xf32, #tpu.memory_space<vmem>>, vector<8x32xf32>,
    %41 = vector.extract_strided_slice %38 {offsets = [0, 32], sizes = [8, 32], strides = [1, 1]} : vector<8x64xf32> to vector<8x32xf32>
    %c48 = arith.constant 48 : index
    %c0_16 = arith.constant 0 : index
    %42 = vector.load %arg9[%c48, %c0_16] : memref<64x32xf32, #tpu.memory_space<vmem>>, vector<8x32xf32>
    tpu.vector_store %arg9[%c48, %c0_16], %41 {strides = array<i32>} : memref<64x32xf32, #tpu.memory_space<vmem>>, vector<8x32xf32>,
    %43 = vector.extract_strided_slice %22 {offsets = [16, 0], sizes = [8, 64], strides = [1, 1]} : vector<64x64xf32> to vector<8x64xf32>
    %cst_17 = arith.constant dense<0.000000e+00> : vector<8x64xf32>
    %44 = tpu.matmul %38, %24, %cst_17 {dimension_numbers = #tpu.dot_dimension_numbers<[1], [0], [0], [1], [0, 0, 1, 1], [], []>} : vector<8x64xf32>, vector<64x64xf32>, vector<8x64xf32> -> vector<8x64xf32>
    %45 = arith.addf %43, %44 : vector<8x64xf32>
    %46 = math.tanh %45 : vector<8x64xf32>
    %47 = vector.extract_strided_slice %46 {offsets = [0, 0], sizes = [8, 32], strides = [1, 1]} : vector<8x64xf32> to vector<8x32xf32>
    %c16 = arith.constant 16 : index
    %c0_18 = arith.constant 0 : index
    %48 = vector.load %arg8[%c16, %c0_18] : memref<64x32xf32, #tpu.memory_space<vmem>>, vector<8x32xf32>
    tpu.vector_store %arg8[%c16, %c0_18], %47 {strides = array<i32>} : memref<64x32xf32, #tpu.memory_space<vmem>>, vector<8x32xf32>,
    %49 = vector.extract_strided_slice %46 {offsets = [0, 32], sizes = [8, 32], strides = [1, 1]} : vector<8x64xf32> to vector<8x32xf32>
    %c40 = arith.constant 40 : index
    %c0_19 = arith.constant 0 : index
    %50 = vector.load %arg9[%c40, %c0_19] : memref<64x32xf32, #tpu.memory_space<vmem>>, vector<8x32xf32>
    tpu.vector_store %arg9[%c40, %c0_19], %49 {strides = array<i32>} : memref<64x32xf32, #tpu.memory_space<vmem>>, vector<8x32xf32>,
    %51 = vector.extract_strided_slice %22 {offsets = [24, 0], sizes = [8, 64], strides = [1, 1]} : vector<64x64xf32> to vector<8x64xf32>
    %cst_20 = arith.constant dense<0.000000e+00> : vector<8x64xf32>
    %52 = tpu.matmul %46, %24, %cst_20 {dimension_numbers = #tpu.dot_dimension_numbers<[1], [0], [0], [1], [0, 0, 1, 1], [], []>} : vector<8x64xf32>, vector<64x64xf32>, vector<8x64xf32> -> vector<8x64xf32>
    %53 = arith.addf %51, %52 : vector<8x64xf32>
    %54 = math.tanh %53 : vector<8x64xf32>
    %55 = vector.extract_strided_slice %54 {offsets = [0, 0], sizes = [8, 32], strides = [1, 1]} : vector<8x64xf32> to vector<8x32xf32>
    %c24 = arith.constant 24 : index
    %c0_21 = arith.constant 0 : index
    %56 = vector.load %arg8[%c24, %c0_21] : memref<64x32xf32, #tpu.memory_space<vmem>>, vector<8x32xf32>
    tpu.vector_store %arg8[%c24, %c0_21], %55 {strides = array<i32>} : memref<64x32xf32, #tpu.memory_space<vmem>>, vector<8x32xf32>,
    %57 = vector.extract_strided_slice %54 {offsets = [0, 32], sizes = [8, 32], strides = [1, 1]} : vector<8x64xf32> to vector<8x32xf32>
    %c32 = arith.constant 32 : index
    %c0_22 = arith.constant 0 : index
    %58 = vector.load %arg9[%c32, %c0_22] : memref<64x32xf32, #tpu.memory_space<vmem>>, vector<8x32xf32>
    tpu.vector_store %arg9[%c32, %c0_22], %57 {strides = array<i32>} : memref<64x32xf32, #tpu.memory_space<vmem>>, vector<8x32xf32>,
    %59 = vector.extract_strided_slice %22 {offsets = [32, 0], sizes = [8, 64], strides = [1, 1]} : vector<64x64xf32> to vector<8x64xf32>
    %cst_23 = arith.constant dense<0.000000e+00> : vector<8x64xf32>
    %60 = tpu.matmul %54, %24, %cst_23 {dimension_numbers = #tpu.dot_dimension_numbers<[1], [0], [0], [1], [0, 0, 1, 1], [], []>} : vector<8x64xf32>, vector<64x64xf32>, vector<8x64xf32> -> vector<8x64xf32>
    %61 = arith.addf %59, %60 : vector<8x64xf32>
    %62 = math.tanh %61 : vector<8x64xf32>
    %63 = vector.extract_strided_slice %62 {offsets = [0, 0], sizes = [8, 32], strides = [1, 1]} : vector<8x64xf32> to vector<8x32xf32>
    %c32_24 = arith.constant 32 : index
    %c0_25 = arith.constant 0 : index
    %64 = vector.load %arg8[%c32_24, %c0_25] : memref<64x32xf32, #tpu.memory_space<vmem>>, vector<8x32xf32>
    tpu.vector_store %arg8[%c32_24, %c0_25], %63 {strides = array<i32>} : memref<64x32xf32, #tpu.memory_space<vmem>>, vector<8x32xf32>,
    %65 = vector.extract_strided_slice %62 {offsets = [0, 32], sizes = [8, 32], strides = [1, 1]} : vector<8x64xf32> to vector<8x32xf32>
    %c24_26 = arith.constant 24 : index
    %c0_27 = arith.constant 0 : index
    %66 = vector.load %arg9[%c24_26, %c0_27] : memref<64x32xf32, #tpu.memory_space<vmem>>, vector<8x32xf32>
    tpu.vector_store %arg9[%c24_26, %c0_27], %65 {strides = array<i32>} : memref<64x32xf32, #tpu.memory_space<vmem>>, vector<8x32xf32>,
    %67 = vector.extract_strided_slice %22 {offsets = [40, 0], sizes = [8, 64], strides = [1, 1]} : vector<64x64xf32> to vector<8x64xf32>
    %cst_28 = arith.constant dense<0.000000e+00> : vector<8x64xf32>
    %68 = tpu.matmul %62, %24, %cst_28 {dimension_numbers = #tpu.dot_dimension_numbers<[1], [0], [0], [1], [0, 0, 1, 1], [], []>} : vector<8x64xf32>, vector<64x64xf32>, vector<8x64xf32> -> vector<8x64xf32>
    %69 = arith.addf %67, %68 : vector<8x64xf32>
    %70 = math.tanh %69 : vector<8x64xf32>
    %71 = vector.extract_strided_slice %70 {offsets = [0, 0], sizes = [8, 32], strides = [1, 1]} : vector<8x64xf32> to vector<8x32xf32>
    %c40_29 = arith.constant 40 : index
    %c0_30 = arith.constant 0 : index
    %72 = vector.load %arg8[%c40_29, %c0_30] : memref<64x32xf32, #tpu.memory_space<vmem>>, vector<8x32xf32>
    tpu.vector_store %arg8[%c40_29, %c0_30], %71 {strides = array<i32>} : memref<64x32xf32, #tpu.memory_space<vmem>>, vector<8x32xf32>,
    %73 = vector.extract_strided_slice %70 {offsets = [0, 32], sizes = [8, 32], strides = [1, 1]} : vector<8x64xf32> to vector<8x32xf32>
    %c16_31 = arith.constant 16 : index
    %c0_32 = arith.constant 0 : index
    %74 = vector.load %arg9[%c16_31, %c0_32] : memref<64x32xf32, #tpu.memory_space<vmem>>, vector<8x32xf32>
    tpu.vector_store %arg9[%c16_31, %c0_32], %73 {strides = array<i32>} : memref<64x32xf32, #tpu.memory_space<vmem>>, vector<8x32xf32>,
    %75 = vector.extract_strided_slice %22 {offsets = [48, 0], sizes = [8, 64], strides = [1, 1]} : vector<64x64xf32> to vector<8x64xf32>
    %cst_33 = arith.constant dense<0.000000e+00> : vector<8x64xf32>
    %76 = tpu.matmul %70, %24, %cst_33 {dimension_numbers = #tpu.dot_dimension_numbers<[1], [0], [0], [1], [0, 0, 1, 1], [], []>} : vector<8x64xf32>, vector<64x64xf32>, vector<8x64xf32> -> vector<8x64xf32>
    %77 = arith.addf %75, %76 : vector<8x64xf32>
    %78 = math.tanh %77 : vector<8x64xf32>
    %79 = vector.extract_strided_slice %78 {offsets = [0, 0], sizes = [8, 32], strides = [1, 1]} : vector<8x64xf32> to vector<8x32xf32>
    %c48_34 = arith.constant 48 : index
    %c0_35 = arith.constant 0 : index
    %80 = vector.load %arg8[%c48_34, %c0_35] : memref<64x32xf32, #tpu.memory_space<vmem>>, vector<8x32xf32>
    tpu.vector_store %arg8[%c48_34, %c0_35], %79 {strides = array<i32>} : memref<64x32xf32, #tpu.memory_space<vmem>>, vector<8x32xf32>,
    %81 = vector.extract_strided_slice %78 {offsets = [0, 32], sizes = [8, 32], strides = [1, 1]} : vector<8x64xf32> to vector<8x32xf32>
    %c8_36 = arith.constant 8 : index
    %c0_37 = arith.constant 0 : index
    %82 = vector.load %arg9[%c8_36, %c0_37] : memref<64x32xf32, #tpu.memory_space<vmem>>, vector<8x32xf32>
    tpu.vector_store %arg9[%c8_36, %c0_37], %81 {strides = array<i32>} : memref<64x32xf32, #tpu.memory_space<vmem>>, vector<8x32xf32>,
    %83 = vector.extract_strided_slice %22 {offsets = [56, 0], sizes = [8, 64], strides = [1, 1]} : vector<64x64xf32> to vector<8x64xf32>
    %cst_38 = arith.constant dense<0.000000e+00> : vector<8x64xf32>
    %84 = tpu.matmul %78, %24, %cst_38 {dimension_numbers = #tpu.dot_dimension_numbers<[1], [0], [0], [1], [0, 0, 1, 1], [], []>} : vector<8x64xf32>, vector<64x64xf32>, vector<8x64xf32> -> vector<8x64xf32>
    %85 = arith.addf %83, %84 : vector<8x64xf32>
    %86 = math.tanh %85 : vector<8x64xf32>
    %87 = vector.extract_strided_slice %86 {offsets = [0, 0], sizes = [8, 32], strides = [1, 1]} : vector<8x64xf32> to vector<8x32xf32>
    %c56_39 = arith.constant 56 : index
    %c0_40 = arith.constant 0 : index
    %88 = vector.load %arg8[%c56_39, %c0_40] : memref<64x32xf32, #tpu.memory_space<vmem>>, vector<8x32xf32>
    tpu.vector_store %arg8[%c56_39, %c0_40], %87 {strides = array<i32>} : memref<64x32xf32, #tpu.memory_space<vmem>>, vector<8x32xf32>,
    %89 = vector.extract_strided_slice %86 {offsets = [0, 32], sizes = [8, 32], strides = [1, 1]} : vector<8x64xf32> to vector<8x32xf32>
    %c0_41 = arith.constant 0 : index
    %c0_42 = arith.constant 0 : index
    %90 = vector.load %arg9[%c0_41, %c0_42] : memref<64x32xf32, #tpu.memory_space<vmem>>, vector<8x32xf32>
    tpu.vector_store %arg9[%c0_41, %c0_42], %89 {strides = array<i32>} : memref<64x32xf32, #tpu.memory_space<vmem>>, vector<8x32xf32>,
    %c0_43 = arith.constant 0 : index
    %c0_44 = arith.constant 0 : index
    %c0_45 = arith.constant 0 : index
    %91 = vector.load %arg7[%c0_43, %c0_44, %c0_45] : memref<2x8x64xf32, #tpu.memory_space<vmem>>, vector<1x8x64xf32>
    %92 = vector.shape_cast %91 : vector<1x8x64xf32> to vector<8x64xf32>
    %93 = vector.shape_cast %86 : vector<8x64xf32> to vector<1x8x64xf32>
    tpu.vector_store %arg7[%c0_43, %c0_44, %c0_45], %93 {strides = array<i32>} : memref<2x8x64xf32, #tpu.memory_space<vmem>>, vector<1x8x64xf32>,
    %c0_46 = arith.constant 0 : index
    %c0_47 = arith.constant 0 : index
    %94 = vector.load %arg8[%c0_46, %c0_47] : memref<64x32xf32, #tpu.memory_space<vmem>>, vector<64x32xf32>
    %c0_48 = arith.constant 0 : index
    %c0_49 = arith.constant 0 : index
    %95 = vector.load %arg9[%c0_48, %c0_49] : memref<64x32xf32, #tpu.memory_space<vmem>>, vector<64x32xf32>
    %96 = tpu.concatenate %94, %95 in 1 : vector<64x32xf32>, vector<64x32xf32> -> vector<64x64xf32>
    %c0_50 = arith.constant 0 : index
    %c0_51 = arith.constant 0 : index
    %c0_52 = arith.constant 0 : index
    %97 = vector.load %arg2[%c0_50, %c0_51, %c0_52] : memref<1x64x64xf32, #tpu.memory_space<vmem>>, vector<1x64x64xf32>
    %98 = vector.shape_cast %97 : vector<1x64x64xf32> to vector<64x64xf32>
    %cst_53 = arith.constant dense<0.000000e+00> : vector<64x64xf32>
    %99 = tpu.matmul %96, %98, %cst_53 {dimension_numbers = #tpu.dot_dimension_numbers<[1], [0], [0], [1], [0, 0, 1, 1], [], []>} : vector<64x64xf32>, vector<64x64xf32>, vector<64x64xf32> -> vector<64x64xf32>
    %c1 = arith.constant 1 : index
    %c0_54 = arith.constant 0 : index
    %100 = vector.load %arg4[%c1, %c0_54] : memref<2x64xf32, #tpu.memory_space<vmem>>, vector<1x64xf32>
    %101 = vector.broadcast %100 : vector<1x64xf32> to vector<64x64xf32>
    %102 = arith.addf %99, %101 : vector<64x64xf32>
    %103 = vector.extract_strided_slice %102 {offsets = [0, 0], sizes = [64, 32], strides = [1, 1]} : vector<64x64xf32> to vector<64x32xf32>
    %104 = vector.extract_strided_slice %102 {offsets = [0, 32], sizes = [64, 32], strides = [1, 1]} : vector<64x64xf32> to vector<64x32xf32>
    %105 = vector.extract_strided_slice %104 {offsets = [56, 0], sizes = [8, 32], strides = [1, 1]} : vector<64x32xf32> to vector<8x32xf32>
    %106 = vector.extract_strided_slice %104 {offsets = [48, 0], sizes = [8, 32], strides = [1, 1]} : vector<64x32xf32> to vector<8x32xf32>
    %107 = vector.extract_strided_slice %104 {offsets = [40, 0], sizes = [8, 32], strides = [1, 1]} : vector<64x32xf32> to vector<8x32xf32>
    %108 = vector.extract_strided_slice %104 {offsets = [32, 0], sizes = [8, 32], strides = [1, 1]} : vector<64x32xf32> to vector<8x32xf32>
    %109 = vector.extract_strided_slice %104 {offsets = [24, 0], sizes = [8, 32], strides = [1, 1]} : vector<64x32xf32> to vector<8x32xf32>
    %110 = vector.extract_strided_slice %104 {offsets = [16, 0], sizes = [8, 32], strides = [1, 1]} : vector<64x32xf32> to vector<8x32xf32>
    %111 = vector.extract_strided_slice %104 {offsets = [8, 0], sizes = [8, 32], strides = [1, 1]} : vector<64x32xf32> to vector<8x32xf32>
    %112 = vector.extract_strided_slice %104 {offsets = [0, 0], sizes = [8, 32], strides = [1, 1]} : vector<64x32xf32> to vector<8x32xf32>
    %113 = tpu.concatenate %105, %106, %107, %108, %109, %110, %111, %112 in 0 : vector<8x32xf32>, vector<8x32xf32>, vector<8x32xf32>, vector<8x32xf32>, vector<8x32xf32>, vector<8x32xf32>, vector<8x32xf32>, vector<8x32xf32> -> vector<64x32xf32>
    %114 = tpu.concatenate %103, %113 in 1 : vector<64x32xf32>, vector<64x32xf32> -> vector<64x64xf32>
    %c1_55 = arith.constant 1 : index
    %c0_56 = arith.constant 0 : index
    %c0_57 = arith.constant 0 : index
    %115 = vector.load %arg3[%c1_55, %c0_56, %c0_57] : memref<2x64x64xf32, #tpu.memory_space<vmem>>, vector<1x64x64xf32>
    %116 = vector.shape_cast %115 : vector<1x64x64xf32> to vector<64x64xf32>
    %c1_58 = arith.constant 1 : index
    %c0_59 = arith.constant 0 : index
    %c0_60 = arith.constant 0 : index
    %117 = vector.load %arg5[%c1_58, %c0_59, %c0_60] : memref<2x8x64xf32, #tpu.memory_space<vmem>>, vector<1x8x64xf32>
    %118 = vector.shape_cast %117 : vector<1x8x64xf32> to vector<8x64xf32>
    %119 = vector.extract_strided_slice %114 {offsets = [0, 0], sizes = [8, 64], strides = [1, 1]} : vector<64x64xf32> to vector<8x64xf32>
    %cst_61 = arith.constant dense<0.000000e+00> : vector<8x64xf32>
    %120 = tpu.matmul %118, %116, %cst_61 {dimension_numbers = #tpu.dot_dimension_numbers<[1], [0], [0], [1], [0, 0, 1, 1], [], []>} : vector<8x64xf32>, vector<64x64xf32>, vector<8x64xf32> -> vector<8x64xf32>
    %121 = arith.addf %119, %120 : vector<8x64xf32>
    %122 = math.tanh %121 : vector<8x64xf32>
    %123 = vector.extract_strided_slice %114 {offsets = [8, 0], sizes = [8, 64], strides = [1, 1]} : vector<64x64xf32> to vector<8x64xf32>
    %cst_62 = arith.constant dense<0.000000e+00> : vector<8x64xf32>
    %124 = tpu.matmul %122, %116, %cst_62 {dimension_numbers = #tpu.dot_dimension_numbers<[1], [0], [0], [1], [0, 0, 1, 1], [], []>} : vector<8x64xf32>, vector<64x64xf32>, vector<8x64xf32> -> vector<8x64xf32>
    %125 = arith.addf %123, %124 : vector<8x64xf32>
    %126 = math.tanh %125 : vector<8x64xf32>
    %127 = vector.extract_strided_slice %114 {offsets = [16, 0], sizes = [8, 64], strides = [1, 1]} : vector<64x64xf32> to vector<8x64xf32>
    %cst_63 = arith.constant dense<0.000000e+00> : vector<8x64xf32>
    %128 = tpu.matmul %126, %116, %cst_63 {dimension_numbers = #tpu.dot_dimension_numbers<[1], [0], [0], [1], [0, 0, 1, 1], [], []>} : vector<8x64xf32>, vector<64x64xf32>, vector<8x64xf32> -> vector<8x64xf32>
    %129 = arith.addf %127, %128 : vector<8x64xf32>
    %130 = math.tanh %129 : vector<8x64xf32>
    %131 = vector.extract_strided_slice %114 {offsets = [24, 0], sizes = [8, 64], strides = [1, 1]} : vector<64x64xf32> to vector<8x64xf32>
    %cst_64 = arith.constant dense<0.000000e+00> : vector<8x64xf32>
    %132 = tpu.matmul %130, %116, %cst_64 {dimension_numbers = #tpu.dot_dimension_numbers<[1], [0], [0], [1], [0, 0, 1, 1], [], []>} : vector<8x64xf32>, vector<64x64xf32>, vector<8x64xf32> -> vector<8x64xf32>
    %133 = arith.addf %131, %132 : vector<8x64xf32>
    %134 = math.tanh %133 : vector<8x64xf32>
    %135 = vector.extract_strided_slice %114 {offsets = [32, 0], sizes = [8, 64], strides = [1, 1]} : vector<64x64xf32> to vector<8x64xf32>
    %cst_65 = arith.constant dense<0.000000e+00> : vector<8x64xf32>
    %136 = tpu.matmul %134, %116, %cst_65 {dimension_numbers = #tpu.dot_dimension_numbers<[1], [0], [0], [1], [0, 0, 1, 1], [], []>} : vector<8x64xf32>, vector<64x64xf32>, vector<8x64xf32> -> vector<8x64xf32>
    %137 = arith.addf %135, %136 : vector<8x64xf32>
    %138 = math.tanh %137 : vector<8x64xf32>
    %139 = vector.extract_strided_slice %114 {offsets = [40, 0], sizes = [8, 64], strides = [1, 1]} : vector<64x64xf32> to vector<8x64xf32>
    %cst_66 = arith.constant dense<0.000000e+00> : vector<8x64xf32>
    %140 = tpu.matmul %138, %116, %cst_66 {dimension_numbers = #tpu.dot_dimension_numbers<[1], [0], [0], [1], [0, 0, 1, 1], [], []>} : vector<8x64xf32>, vector<64x64xf32>, vector<8x64xf32> -> vector<8x64xf32>
    %141 = arith.addf %139, %140 : vector<8x64xf32>
    %142 = math.tanh %141 : vector<8x64xf32>
    %143 = vector.extract_strided_slice %114 {offsets = [48, 0], sizes = [8, 64], strides = [1, 1]} : vector<64x64xf32> to vector<8x64xf32>
    %cst_67 = arith.constant dense<0.000000e+00> : vector<8x64xf32>
    %144 = tpu.matmul %142, %116, %cst_67 {dimension_numbers = #tpu.dot_dimension_numbers<[1], [0], [0], [1], [0, 0, 1, 1], [], []>} : vector<8x64xf32>, vector<64x64xf32>, vector<8x64xf32> -> vector<8x64xf32>
    %145 = arith.addf %143, %144 : vector<8x64xf32>
    %146 = math.tanh %145 : vector<8x64xf32>
    %147 = vector.extract_strided_slice %114 {offsets = [56, 0], sizes = [8, 64], strides = [1, 1]} : vector<64x64xf32> to vector<8x64xf32>
    %cst_68 = arith.constant dense<0.000000e+00> : vector<8x64xf32>
    %148 = tpu.matmul %146, %116, %cst_68 {dimension_numbers = #tpu.dot_dimension_numbers<[1], [0], [0], [1], [0, 0, 1, 1], [], []>} : vector<8x64xf32>, vector<64x64xf32>, vector<8x64xf32> -> vector<8x64xf32>
    %149 = arith.addf %147, %148 : vector<8x64xf32>
    %150 = math.tanh %149 : vector<8x64xf32>
    %c1_69 = arith.constant 1 : index
    %c0_70 = arith.constant 0 : index
    %c0_71 = arith.constant 0 : index
    %151 = vector.load %arg7[%c1_69, %c0_70, %c0_71] : memref<2x8x64xf32, #tpu.memory_space<vmem>>, vector<1x8x64xf32>
    %152 = vector.shape_cast %151 : vector<1x8x64xf32> to vector<8x64xf32>
    %153 = vector.shape_cast %150 : vector<8x64xf32> to vector<1x8x64xf32>
    tpu.vector_store %arg7[%c1_69, %c0_70, %c0_71], %153 {strides = array<i32>} : memref<2x8x64xf32, #tpu.memory_space<vmem>>, vector<1x8x64xf32>,
    %154 = vector.extract_strided_slice %122 {offsets = [0, 0], sizes = [8, 32], strides = [1, 1]} : vector<8x64xf32> to vector<8x32xf32>
    %155 = vector.extract_strided_slice %150 {offsets = [0, 32], sizes = [8, 32], strides = [1, 1]} : vector<8x64xf32> to vector<8x32xf32>
    %156 = tpu.concatenate %154, %155 in 1 : vector<8x32xf32>, vector<8x32xf32> -> vector<8x64xf32>
    %157 = vector.extract_strided_slice %126 {offsets = [0, 0], sizes = [8, 32], strides = [1, 1]} : vector<8x64xf32> to vector<8x32xf32>
    %158 = vector.extract_strided_slice %146 {offsets = [0, 32], sizes = [8, 32], strides = [1, 1]} : vector<8x64xf32> to vector<8x32xf32>
    %159 = tpu.concatenate %157, %158 in 1 : vector<8x32xf32>, vector<8x32xf32> -> vector<8x64xf32>
    %160 = vector.extract_strided_slice %130 {offsets = [0, 0], sizes = [8, 32], strides = [1, 1]} : vector<8x64xf32> to vector<8x32xf32>
    %161 = vector.extract_strided_slice %142 {offsets = [0, 32], sizes = [8, 32], strides = [1, 1]} : vector<8x64xf32> to vector<8x32xf32>
    %162 = tpu.concatenate %160, %161 in 1 : vector<8x32xf32>, vector<8x32xf32> -> vector<8x64xf32>
    %163 = vector.extract_strided_slice %134 {offsets = [0, 0], sizes = [8, 32], strides = [1, 1]} : vector<8x64xf32> to vector<8x32xf32>
    %164 = vector.extract_strided_slice %138 {offsets = [0, 32], sizes = [8, 32], strides = [1, 1]} : vector<8x64xf32> to vector<8x32xf32>
    %165 = tpu.concatenate %163, %164 in 1 : vector<8x32xf32>, vector<8x32xf32> -> vector<8x64xf32>
    %166 = vector.extract_strided_slice %138 {offsets = [0, 0], sizes = [8, 32], strides = [1, 1]} : vector<8x64xf32> to vector<8x32xf32>
    %167 = vector.extract_strided_slice %134 {offsets = [0, 32], sizes = [8, 32], strides = [1, 1]} : vector<8x64xf32> to vector<8x32xf32>
    %168 = tpu.concatenate %166, %167 in 1 : vector<8x32xf32>, vector<8x32xf32> -> vector<8x64xf32>
    %169 = vector.extract_strided_slice %142 {offsets = [0, 0], sizes = [8, 32], strides = [1, 1]} : vector<8x64xf32> to vector<8x32xf32>
    %170 = vector.extract_strided_slice %130 {offsets = [0, 32], sizes = [8, 32], strides = [1, 1]} : vector<8x64xf32> to vector<8x32xf32>
    %171 = tpu.concatenate %169, %170 in 1 : vector<8x32xf32>, vector<8x32xf32> -> vector<8x64xf32>
    %172 = vector.extract_strided_slice %146 {offsets = [0, 0], sizes = [8, 32], strides = [1, 1]} : vector<8x64xf32> to vector<8x32xf32>
    %173 = vector.extract_strided_slice %126 {offsets = [0, 32], sizes = [8, 32], strides = [1, 1]} : vector<8x64xf32> to vector<8x32xf32>
    %174 = tpu.concatenate %172, %173 in 1 : vector<8x32xf32>, vector<8x32xf32> -> vector<8x64xf32>
    %175 = vector.extract_strided_slice %150 {offsets = [0, 0], sizes = [8, 32], strides = [1, 1]} : vector<8x64xf32> to vector<8x32xf32>
    %176 = vector.extract_strided_slice %122 {offsets = [0, 32], sizes = [8, 32], strides = [1, 1]} : vector<8x64xf32> to vector<8x32xf32>
    %177 = tpu.concatenate %175, %176 in 1 : vector<8x32xf32>, vector<8x32xf32> -> vector<8x64xf32>
    %178 = tpu.concatenate %156, %159, %162, %165, %168, %171, %174, %177 in 1 : vector<8x64xf32>, vector<8x64xf32>, vector<8x64xf32>, vector<8x64xf32>, vector<8x64xf32>, vector<8x64xf32>, vector<8x64xf32>, vector<8x64xf32> -> vector<8x512xf32>
    %c0_72 = arith.constant 0 : index
    %c0_73 = arith.constant 0 : index
    %179 = vector.load %arg6[%c0_72, %c0_73] : memref<8x512xf32, #tpu.memory_space<vmem>>, vector<8x512xf32>
    tpu.vector_store %arg6[%c0_72, %c0_73], %178 {strides = array<i32>} : memref<8x512xf32, #tpu.memory_space<vmem>>, vector<8x512xf32>,
    return
  }
}

</mosaic_0001>

<bundles_post_ra>
// kernel: tone_net_rnn_forward.1
= control target key start
LH: loop header
LB: loop body
LE: loop exit
PB: predicated region body
PF: predicated region fallthrough
CT: control target
= control target key end

     0   :  { %13 = vsyncpa [#allocation5], 0  ;;  %s908_s27 = smov [#allocation4]   ;;  %s909_s29 = smov 128   ;;  %s1327_s0 = inlined_call_operand.vmem [shape: f32[64,1], index: 0, kind: input, shape index: {}]   ;;  %s1328_s1 = inlined_call_operand.vmem [shape: f32[2,32], index: 1, kind: input, shape index: {}]   ;;  %s1329_s2 = inlined_call_operand.hbm [shape: f32[1,64,64], index: 2, kind: input, shape index: {}]   ;;  %s1330_s3 = inlined_call_operand.vmem [shape: f32[2,64,64], index: 3, kind: input, shape index: {}]   ;;  %s1331_s4 = inlined_call_operand.vmem [shape: f32[2,64], index: 4, kind: input, shape index: {}]   ;;  %s1332_s5 = inlined_call_operand.vmem [shape: f32[2,8,64], index: 5, kind: input, shape index: {}]   ;;  %s1333_s6 = inlined_call_operand.vmem [shape: f32[8,512], index: 6, kind: output, shape index: {0}]   ;;  %s1334_s7 = inlined_call_operand.vmem [shape: f32[2,8,64], index: 7, kind: output, shape index: {1}]  }
   0x1   :  { %s22_s26 = sshll.u32 %s1329_s2, 4  ;;  %s24_s28 = sshll.u32 %s908_s27, 4  ;;  %s23_s26 = int_to_ptr.hbm [resolvable:$true] %s22_s26  ;;  %s25_s28 = int_to_ptr.vmem [resolvable:$true] %s24_s28 }
   0x2   :  { %s910_s30 = smov 8  }
   0x3   :  { %30 = dma.hbm_to_vmem [thread:$0]  %s23_s26, 1024, %s25_s28, [#allocation5], %s909_s29, %s909_s29, %s910_s30  }
   0x4   :  { %906 = dma.done.wait [#allocation5], 1024  }
   0x5   :  { %907 = vsyncadd [#allocation5], 4294966272  ;;  %v911_v0 = vmov 0   ;;  %v48_v1 = vld [vmem:[%s1327_s0 + $0x38] sm:$0xff]  ;;  %v969_v3 = vld [vmem:[%s1330_s3 + $0x30] sm:$0xff]  ;;  %vm168_vm0 = vcmask 523264  }
   0x6   :  { %845 = vset.pattern.permute.xlu0 %v911_v0  ;;  %846 = vset.pattern.permute.xlu1 %v911_v0  ;;  %v964_v2 = vld [vmem:[%s1330_s3 + $0x38] sm:$0xff]  ;;  %v976_v4 = vld [vmem:[%s1330_s3 + $0x28] sm:$0xff]  ;;  %v985_v5 = vld [vmem:[%s1330_s3 + $0x20] sm:$0xff]  ;;  %s912_s13 = smov 32   ;;  %vm140_vm1 = vcmask 261120  }
   0x7   :  { %847 = vset.pattern.permute.xlu2 %v911_v0  ;;  %87 = vperm.xlu0 %845, %v48_v1   ;;  %v41_v6 = vld [vmem:[%s1327_s0] sm:$0xff]  ;;  %v162_v7 = vld [vmem:[%s1330_s3 + $0x18] sm:$0xff]  ;;  %v161_v8 = vld [vmem:[%s1330_s3 + $0x10] sm:$0xff] }
   0x8   :  { %180 = vmatpush.msra.mxu3 %v964_v2  ;;  %210 = vmatpush.msra.mxu1 %v964_v2  ;;  %v160_v9 = vld [vmem:[%s1330_s3 + $0x8] sm:$0xff]  ;;  %v159_v10 = vld [vmem:[%s1330_s3] sm:$0xff]  ;;  %v47_v19 = vld [vmem:[%s1327_s0 + $0x30] sm:$0xff] }
   0x9   :  { %240 = vmatpush.msra.mxu2 %v964_v2  ;;  %300 = vmatpush.msra.mxu0 %v964_v2  ;;  %v46_v11 = vld [vmem:[%s1327_s0 + $0x28] sm:$0xff]  ;;  %v167_v12 = vld [vmem:[%s1332_s5] sm:$0xff]  ;;  %v43_v20 = vld [vmem:[%s1327_s0 + $0x10] sm:$0xff] }
   0xa   :  { %181 = vmatpush.msra.mxu3 %v969_v3  ;;  %211 = vmatpush.msra.mxu1 %v969_v3  ;;  %v45_v13 = vld [vmem:[%s1327_s0 + $0x20] sm:$0xff]  ;;  %v42_v15 = vld [vmem:[%s1327_s0 + $0x8] sm:$0xff]  ;;  %v44_v21 = vld [vmem:[%s1327_s0 + $0x18] sm:$0xff]  ;;  %s913_s0 = smov 96  }
   0xb   :  { %241 = vmatpush.msra.mxu2 %v969_v3  ;;  %301 = vmatpush.msra.mxu0 %v969_v3  ;;  %v49_v14 = vld [vmem:[%s1328_s1] sm:$0x3] }
   0xc   :  { %182 = vmatpush.msra.mxu3 %v976_v4  ;;  %212 = vmatpush.msra.mxu1 %v976_v4  ;;  %v99_v16 = vperm.slane %v49_v14, 1  ;;  %v1057_v23 = vperm.slane %v49_v14, 0  ;;  %v1062_v24 = vld [vmem:[%s1331_s4] ss:$0 sm:$0xff] }
   0xd   :  { %242 = vmatpush.msra.mxu2 %v976_v4  ;;  %302 = vmatpush.msra.mxu0 %v976_v4 }
   0xe   :  { %183 = vmatpush.msra.mxu3 %v985_v5  ;;  %213 = vmatpush.msra.mxu1 %v985_v5 }
   0xf   :  { %52 = vperm.xlu0 %845, %v41_v6   ;;  %243 = vmatpush.msra.mxu2 %v985_v5 }
  0x10   :  { %184 = vmatpush.msra.mxu3 %v162_v7  ;;  %214 = vmatpush.msra.mxu1 %v162_v7 }
  0x11   :  { %244 = vmatpush.msra.mxu2 %v162_v7  ;;  %303 = vmatpush.msra.mxu0 %v985_v5 }
  0x12   :  { %185 = vmatpush.msra.mxu3 %v161_v8  ;;  %215 = vmatpush.msra.mxu1 %v161_v8 }
  0x13   :  { %245 = vmatpush.msra.mxu2 %v161_v8  ;;  %304 = vmatpush.msra.mxu0 %v162_v7 }
  0x14   :  { %186 = vmatpush.msra.mxu3 %v160_v9  ;;  %216 = vmatpush.msra.mxu1 %v160_v9 }
  0x15   :  { %246 = vmatpush.msra.mxu2 %v160_v9  ;;  %305 = vmatpush.msra.mxu0 %v161_v8 }
  0x16   :  { %187 = vmatpush.msra.mxu3 %v159_v10  ;;  %217 = vmatpush.msra.mxu1 %v159_v10 }
  0x17   :  { %77 = vperm.xlu0 %845, %v46_v11   ;;  %804 = vmatmul.msk.f32.vlgmr.msra.gmra.mxu3 %vm168_vm0, %v167_v12 }
  0x18   :  { %247 = vmatpush.msra.mxu2 %v159_v10  ;;  %270 = vmatpush.msrb.mxu3 %v964_v2 }
  0x19   :  { %306 = vmatpush.msra.mxu0 %v160_v9  ;;  %330 = vmatpush.msrb.mxu1 %v964_v2 }
  0x1a   :  { %271 = vmatpush.msrb.mxu3 %v969_v3  ;;  %360 = vmatpush.msrb.mxu2 %v964_v2 }
  0x1b   :  { %307 = vmatpush.msra.mxu0 %v159_v10  ;;  %331 = vmatpush.msrb.mxu1 %v969_v3 }
  0x1c   :  { %272 = vmatpush.msrb.mxu3 %v976_v4  ;;  %361 = vmatpush.msrb.mxu2 %v969_v3 }
  0x1d   :  { %332 = vmatpush.msrb.mxu1 %v976_v4  ;;  %57 = vperm.xlu2 %847, %v42_v15  }
  0x1e   :  { %273 = vmatpush.msrb.mxu3 %v985_v5  ;;  %362 = vmatpush.msrb.mxu2 %v976_v4 }
  0x1f   :  { %72 = vperm.xlu0 %845, %v45_v13   ;;  %333 = vmatpush.msrb.mxu1 %v985_v5 }
  0x20   :  { %274 = vmatpush.msrb.mxu3 %v162_v7  ;;  %363 = vmatpush.msrb.mxu2 %v985_v5 }
  0x21   :  { %334 = vmatpush.msrb.mxu1 %v162_v7 }
  0x22   :  { %275 = vmatpush.msrb.mxu3 %v161_v8  ;;  %364 = vmatpush.msrb.mxu2 %v162_v7 }
  0x23   :  { %335 = vmatpush.msrb.mxu1 %v161_v8 }
  0x24   :  { %276 = vmatpush.msrb.mxu3 %v160_v9  ;;  %365 = vmatpush.msrb.mxu2 %v161_v8 }
  0x25   :  { %336 = vmatpush.msrb.mxu1 %v160_v9 }
  0x26   :  { %277 = vmatpush.msrb.mxu3 %v159_v10  ;;  %366 = vmatpush.msrb.mxu2 %v160_v9 }
  0x27   :  { %337 = vmatpush.msrb.mxu1 %v159_v10 }
  0x28   :  { %390 = vmatpush.msra.mxu3 %v964_v2  ;;  %367 = vmatpush.msrb.mxu2 %v159_v10 }
  0x2a   :  { %391 = vmatpush.msra.mxu3 %v969_v3 }
  0x2c   :  { %392 = vmatpush.msra.mxu3 %v976_v4 }
  0x2e   :  { %393 = vmatpush.msra.mxu3 %v985_v5 }
  0x30   :  { %394 = vmatpush.msra.mxu3 %v162_v7 }
  0x32   :  { %395 = vmatpush.msra.mxu3 %v161_v8 }
  0x34   :  { %396 = vmatpush.msra.mxu3 %v160_v9 }
  0x36   :  { %397 = vmatpush.msra.mxu3 %v159_v10 }
  0x77   :  { %v58_v42 = vpop.permute.xlu2 %57 }
  0x78   :  { %v101_v43 = vmul.f32 %v99_v16, %v58_v42  ;;  %v92_v45 = vmul.f32 %v1057_v23, %v58_v42  ;;  %v472_v42 = vld [vmem:[#allocation4 + $0x28] sm:$0xff] }
  0x79   :  { %v1044_v17 = vpop.permute.xlu0 %87 }
  0x7a   :  { %v107_v18 = vmul.f32 %v99_v16, %v1044_v17 }
  0x7c   :  { %116 = vrot.lane.b32.xlu1 %v107_v18, %s912_s13 }
  0x81   :  { %v53_v22 = vpop.permute.xlu0 %52 }
  0x82   :  { %v91_v25 = vmul.f32 %v1057_v23, %v53_v22  ;;  %v100_v44 = vmul.f32 %v99_v16, %v53_v22 }
  0x84   :  { %82 = vperm.xlu1 %846, %v47_v19  }
  0x89   :  { %v78_v34 = vpop.permute.xlu0 %77 }
  0x8a   :  { %v105_v36 = vmul.f32 %v99_v16, %v78_v34  ;;  %v96_v10 = vmul.f32 %v1057_v23, %v78_v34 }
  0x8c   :  { %62 = vperm.xlu1 %846, %v43_v20  }
  0x91   :  { %v73_v38 = vpop.permute.xlu0 %72 }
  0x92   :  { %v104_v40 = vmul.f32 %v99_v16, %v73_v38  ;;  %v95_v3 = vmul.f32 %v1057_v23, %v73_v38 }
  0x94   :  { %67 = vperm.xlu1 %846, %v44_v21  }
  0x9a   :  { %v189_v28 = vpop.f32.mrf.mxu3 }
  0xee   :  { %v117_v26 = vpop.permute.xlu1 %116 }
  0xef   :  { %v141_v27 = vsel %vm140_vm1, %v91_v25, %v117_v26 }
  0xf0   :  { %v151_v29 = vadd.f32 %v1062_v24, %v141_v27 }
  0xf2   :  { %v192_v30 = vadd.f32 %v189_v28, %v151_v29 }
  0xf4   :  { %850 = vtanh.f32 %v192_v30 }
  0xf6   :  { %v1067_v31 = vpop.permute.xlu1 %82 }
  0xf7   :  { %v106_v32 = vmul.f32 %v99_v16, %v1067_v31  ;;  %v97_v21 = vmul.f32 %v1057_v23, %v1067_v31 }
  0xf9   :  { %118 = vrot.lane.b32.xlu2 %v106_v32, %s912_s13 }
  0xfa   :  { %v1071_v33 = vpop.eup %850 }
  0xfb   :  { %194 = vst.msk [vmem:[#allocation2] sm:$0xff] %vm140_vm1, %v1071_v33  ;;  %805 = vmatmul.msk.f32.vlgmr.msra.gmra.mxu1 %vm168_vm0, %v1071_v33 }
  0xfe   :  { %v63_v35 = vpop.permute.xlu1 %62 }
  0xff   :  { %v102_v37 = vmul.f32 %v99_v16, %v63_v35  ;;  %v93_v53 = vmul.f32 %v1057_v23, %v63_v35 }
 0x101   :  { %126 = vrot.lane.b32.xlu1 %v102_v37, %s912_s13  ;;  %120 = vrot.lane.b32.xlu2 %v105_v36, %s912_s13  ;;  %v98_v36 = vmul.f32 %v1057_v23, %v1044_v17  ;;  %v474_v17 = vld [vmem:[#allocation4 + $0x38] sm:$0xff] }
 0x102   :  { %509 = vmatpush.msrb.mxu0 %v474_v17 }
 0x106   :  { %v68_v39 = vpop.permute.xlu1 %67 }
 0x107   :  { %v103_v41 = vmul.f32 %v99_v16, %v68_v39  ;;  %v94_v60 = vmul.f32 %v1057_v23, %v68_v39  ;;  %v473_v23 = vld [vmem:[#allocation4 + $0x30] sm:$0xff] }
 0x108   :  { %510 = vmatpush.msrb.mxu0 %v473_v23 }
 0x109   :  { %124 = vrot.lane.b32.xlu0 %v103_v41, %s912_s13  ;;  %122 = vrot.lane.b32.xlu2 %v104_v40, %s912_s13 }
 0x10a   :  { %511 = vmatpush.msrb.mxu0 %v472_v42 }
 0x111   :  { %130 = vrot.lane.b32.xlu0 %v100_v44, %s912_s13  ;;  %128 = vrot.lane.b32.xlu2 %v101_v43, %s912_s13  ;;  %v470_v43 = vld [vmem:[#allocation4 + $0x18] sm:$0xff] }
 0x153   :  { %v119_v46 = vpop.permute.xlu2 %118 }
 0x154   :  { %v142_v47 = vsel %vm140_vm1, %v92_v45, %v119_v46  ;;  %v469_v45 = vld [vmem:[#allocation4 + $0x10] sm:$0xff]  ;;  %v468_v46 = vld [vmem:[#allocation4 + $0x8] sm:$0xff] }
 0x155   :  { %v152_v48 = vadd.f32 %v1062_v24, %v142_v47 }
 0x15b   :  { %v121_v52 = vpop.permute.xlu2 %120 }
 0x15c   :  { %v143_v54 = vsel %vm140_vm1, %v93_v53, %v121_v52  ;;  %v467_v52 = vld [vmem:[#allocation4] sm:$0xff] }
 0x15d   :  { %v153_v55 = vadd.f32 %v1062_v24, %v143_v54  ;;  %v411_v53 = vld [vmem:[#allocation2] sm:$0xff] }
 0x163   :  { %v123_v59 = vpop.permute.xlu2 %122 }
 0x164   :  { %v144_v61 = vsel %vm140_vm1, %v94_v60, %v123_v59 }
 0x165   :  { %v154_v62 = vadd.f32 %v1062_v24, %v144_v61 }
 0x16b   :  { %v129_v20 = vpop.permute.xlu2 %128 }
 0x16c   :  { %v147_v22 = vsel %vm140_vm1, %v97_v21, %v129_v20  ;;  %v828_v20 = vld [vmem:[%s1332_s5 + $0x8] sm:$0xff] }
 0x16d   :  { %v157_v25 = vadd.f32 %v1062_v24, %v147_v22 }
 0x173   :  { %v127_v9 = vpop.permute.xlu1 %126 }
 0x174   :  { %v146_v11 = vsel %vm140_vm1, %v96_v10, %v127_v9 }
 0x175   :  { %v156_v12 = vadd.f32 %v1062_v24, %v146_v11 }
 0x178   :  { %v219_v49 = vpop.f32.mrf.mxu1 }
 0x179   :  { %v222_v50 = vadd.f32 %v219_v49, %v152_v48 }
 0x17b   :  { %852 = vtanh.f32 %v222_v50  ;;  %v125_v2 = vpop.permute.xlu0 %124 }
 0x17c   :  { %v145_v4 = vsel %vm140_vm1, %v95_v3, %v125_v2 }
 0x17d   :  { %v155_v5 = vadd.f32 %v1062_v24, %v145_v4 }
 0x181   :  { %v853_v51 = vpop.eup %852 }
 0x182   :  { %224 = vst.msk [vmem:[#allocation2 + $0x8] sm:$0xff] %vm140_vm1, %v853_v51  ;;  %806 = vmatmul.msk.f32.vlgmr.msra.gmra.mxu2 %vm168_vm0, %v853_v51 }
 0x183   :  { %v131_v16 = vpop.permute.xlu0 %130 }
 0x184   :  { %v148_v37 = vsel %vm140_vm1, %v98_v36, %v131_v16  ;;  %v1201_v16 = vld [vmem:[%s1330_s3 + $0x50] sm:$0xff] }
 0x185   :  { %v158_v38 = vadd.f32 %v1062_v24, %v148_v37  ;;  %v471_v24 = vld [vmem:[#allocation4 + $0x20] sm:$0xff] }
 0x186   :  { %512 = vmatpush.msrb.mxu0 %v471_v24 }
 0x188   :  { %513 = vmatpush.msrb.mxu0 %v470_v43 }
 0x18a   :  { %514 = vmatpush.msrb.mxu0 %v469_v45 }
 0x18c   :  { %515 = vmatpush.msrb.mxu0 %v468_v46 }
 0x18e   :  { %516 = vmatpush.msrb.mxu0 %v467_v52 }
 0x205   :  { %v249_v56 = vpop.f32.mrf.mxu2 }
 0x206   :  { %v252_v57 = vadd.f32 %v249_v56, %v153_v55 }
 0x208   :  { %854 = vtanh.f32 %v252_v57 }
 0x20e   :  { %v855_v58 = vpop.eup %854 }
 0x20f   :  { %254 = vst.msk [vmem:[#allocation2 + $0x10] sm:$0xff] %vm140_vm1, %v855_v58  ;;  %807 = vmatmul.msk.f32.vlgmr.msrb.gmra.mxu3 %vm168_vm0, %v855_v58 }
 0x216   :  { %v413_v61 = vld [vmem:[#allocation2 + $0x10] sm:$0xff] }
 0x292   :  { %v279_v63 = vpop.f32.mrf.mxu3 }
 0x293   :  { %v282_v0 = vadd.f32 %v279_v63, %v154_v62  ;;  %v1157_v63 = vld [vmem:[%s1330_s3 + $0x78] sm:$0xff] }
 0x294   :  { %572 = vmatpush.msra.mxu1 %v1157_v63  ;;  %597 = vmatpush.msra.mxu2 %v1157_v63 }
 0x295   :  { %856 = vtanh.f32 %v282_v0  ;;  %v1162_v0 = vld [vmem:[%s1330_s3 + $0x70] sm:$0xff]  ;;  %622 = vmatpush.msrb.mxu3 %v1157_v63 }
 0x296   :  { %573 = vmatpush.msra.mxu1 %v1162_v0  ;;  %598 = vmatpush.msra.mxu2 %v1162_v0 }
 0x297   :  { %623 = vmatpush.msrb.mxu3 %v1162_v0 }
 0x29b   :  { %v857_v1 = vpop.eup %856 }
 0x29c   :  { %284 = vst.msk [vmem:[#allocation2 + $0x18] sm:$0xff] %vm140_vm1, %v857_v1  ;;  %808 = vmatmul.msk.f32.vlgmr.msra.gmra.mxu0 %vm168_vm0, %v857_v1 }
 0x2a3   :  { %v414_v3 = vld [vmem:[#allocation2 + $0x18] sm:$0xff] }
 0x319   :  { %v309_v6 = vpop.f32.mrf.mxu0 }
 0x31a   :  { %v312_v7 = vadd.f32 %v309_v6, %v155_v5 }
 0x31c   :  { %858 = vtanh.f32 %v312_v7 }
 0x322   :  { %v859_v8 = vpop.eup %858 }
 0x323   :  { %314 = vst.msk [vmem:[#allocation2 + $0x20] sm:$0xff] %vm140_vm1, %v859_v8  ;;  %809 = vmatmul.msk.f32.vlgmr.msrb.gmra.mxu1 %vm168_vm0, %v859_v8 }
 0x32a   :  { %v415_v6 = vld [vmem:[#allocation2 + $0x20] sm:$0xff] }
 0x3a0   :  { %v339_v13 = vpop.f32.mrf.mxu1 }
 0x3a1   :  { %v342_v14 = vadd.f32 %v339_v13, %v156_v12 }
 0x3a3   :  { %860 = vtanh.f32 %v342_v14  ;;  %v1189_v14 = vld [vmem:[%s1330_s3 + $0x60] sm:$0xff] }
 0x3a9   :  { %v861_v15 = vpop.eup %860 }
 0x3aa   :  { %344 = vst.msk [vmem:[#allocation2 + $0x28] sm:$0xff] %vm140_vm1, %v861_v15  ;;  %346 = vrot.lane.b32.xlu0 %v861_v15, %s913_s0  ;;  %810 = vmatmul.msk.f32.vlgmr.msrb.gmra.mxu2 %vm168_vm0, %v861_v15  ;;  %v1195_v15 = vld [vmem:[%s1330_s3 + $0x58] sm:$0xff] }
 0x3b1   :  { %v416_v9 = vld [vmem:[#allocation2 + $0x28] sm:$0xff] }
 0x3b2   :  { %256 = vrot.lane.b32.xlu0 %v855_v58, %s913_s0  ;;  %v412_v58 = vld [vmem:[#allocation2 + $0x8] sm:$0xff] }
 0x41c   :  { %v347_v18 = vpop.permute.xlu0 %346 }
 0x41d   :  { %349 = vst.msk [vmem:[#allocation3 + $0x10] sm:$0xff] %vm140_vm1, %v347_v18  ;;  %v1212_v18 = vld [vmem:[%s1330_s3 + $0x48] sm:$0xff] }
 0x424   :  { %v257_v19 = vpop.permute.xlu0 %256  ;;  %v421_v29 = vld [vmem:[#allocation3 + $0x10] sm:$0xff] }
 0x425   :  { %259 = vst.msk [vmem:[#allocation3 + $0x28] sm:$0xff] %vm140_vm1, %v257_v19  ;;  %v1220_v19 = vld [vmem:[%s1330_s3 + $0x40] sm:$0xff] }
 0x42c   :  { %v424_v30 = vld [vmem:[#allocation3 + $0x28] sm:$0xff] }
 0x42d   :  { %v369_v26 = vpop.f32.mrf.mxu2 }
 0x42e   :  { %v372_v27 = vadd.f32 %v369_v26, %v157_v25 }
 0x430   :  { %862 = vtanh.f32 %v372_v27 }
 0x436   :  { %v863_v28 = vpop.eup %862 }
 0x437   :  { %374 = vst.msk [vmem:[#allocation2 + $0x30] sm:$0xff] %vm140_vm1, %v863_v28  ;;  %376 = vrot.lane.b32.xlu2 %v863_v28, %s913_s0  ;;  %811 = vmatmul.msk.f32.vlgmr.msra.gmra.mxu3 %vm168_vm0, %v863_v28 }
 0x43e   :  { %v417_v12 = vld [vmem:[#allocation2 + $0x30] sm:$0xff] }
 0x43f   :  { %286 = vrot.lane.b32.xlu2 %v857_v1, %s913_s0  ;;  %v1169_v1 = vld [vmem:[%s1330_s3 + $0x68] sm:$0xff] }
 0x440   :  { %574 = vmatpush.msra.mxu1 %v1169_v1  ;;  %599 = vmatpush.msra.mxu2 %v1169_v1 }
 0x441   :  { %624 = vmatpush.msrb.mxu3 %v1169_v1 }
 0x442   :  { %575 = vmatpush.msra.mxu1 %v1189_v14  ;;  %600 = vmatpush.msra.mxu2 %v1189_v14 }
 0x443   :  { %625 = vmatpush.msrb.mxu3 %v1189_v14 }
 0x444   :  { %576 = vmatpush.msra.mxu1 %v1195_v15  ;;  %601 = vmatpush.msra.mxu2 %v1195_v15 }
 0x445   :  { %626 = vmatpush.msrb.mxu3 %v1195_v15 }
 0x446   :  { %577 = vmatpush.msra.mxu1 %v1201_v16  ;;  %602 = vmatpush.msra.mxu2 %v1201_v16 }
 0x447   :  { %226 = vrot.lane.b32.xlu2 %v853_v51, %s913_s0  ;;  %627 = vmatpush.msrb.mxu3 %v1201_v16 }
 0x448   :  { %578 = vmatpush.msra.mxu1 %v1212_v18  ;;  %603 = vmatpush.msra.mxu2 %v1212_v18 }
 0x449   :  { %628 = vmatpush.msrb.mxu3 %v1212_v18 }
 0x44a   :  { %579 = vmatpush.msra.mxu1 %v1220_v19  ;;  %604 = vmatpush.msra.mxu2 %v1220_v19 }
 0x44b   :  { %829 = vmatmul.msk.f32.vlgmr.msra.gmra.mxu1 %vm168_vm0, %v828_v20  ;;  %629 = vmatpush.msrb.mxu3 %v1220_v19 }
 0x44c   :  { %647 = vmatpush.msrb.mxu1 %v1157_v63  ;;  %672 = vmatpush.msrb.mxu2 %v1157_v63 }
 0x44d   :  { %697 = vmatpush.msra.mxu3 %v1157_v63 }
 0x44e   :  { %648 = vmatpush.msrb.mxu1 %v1162_v0  ;;  %673 = vmatpush.msrb.mxu2 %v1162_v0 }
 0x44f   :  { %439 = vrot.lane.b32.xlu2 %v421_v29, %s912_s13  ;;  %698 = vmatpush.msra.mxu3 %v1162_v0 }
 0x450   :  { %649 = vmatpush.msrb.mxu1 %v1169_v1  ;;  %674 = vmatpush.msrb.mxu2 %v1169_v1 }
 0x451   :  { %699 = vmatpush.msra.mxu3 %v1169_v1 }
 0x452   :  { %650 = vmatpush.msrb.mxu1 %v1189_v14  ;;  %675 = vmatpush.msrb.mxu2 %v1189_v14 }
 0x453   :  { %700 = vmatpush.msra.mxu3 %v1189_v14 }
 0x454   :  { %651 = vmatpush.msrb.mxu1 %v1195_v15  ;;  %676 = vmatpush.msrb.mxu2 %v1195_v15 }
 0x455   :  { %701 = vmatpush.msra.mxu3 %v1195_v15 }
 0x456   :  { %652 = vmatpush.msrb.mxu1 %v1201_v16  ;;  %677 = vmatpush.msrb.mxu2 %v1201_v16 }
 0x457   :  { %445 = vrot.lane.b32.xlu2 %v424_v30, %s912_s13  ;;  %702 = vmatpush.msra.mxu3 %v1201_v16  ;;  %v849_v30 = vld [vmem:[%s1331_s4 + $0x1] ss:$0 sm:$0xff]  ;;  %s914_s4 = smov 64  }
 0x458   :  { %653 = vmatpush.msrb.mxu1 %v1212_v18  ;;  %678 = vmatpush.msrb.mxu2 %v1212_v18 }
 0x459   :  { %703 = vmatpush.msra.mxu3 %v1212_v18 }
 0x45a   :  { %654 = vmatpush.msrb.mxu1 %v1220_v19  ;;  %679 = vmatpush.msrb.mxu2 %v1220_v19 }
 0x45b   :  { %704 = vmatpush.msra.mxu3 %v1220_v19 }
 0x45c   :  { %722 = vmatpush.msra.mxu1 %v1157_v63 }
 0x45e   :  { %723 = vmatpush.msra.mxu1 %v1162_v0 }
 0x460   :  { %724 = vmatpush.msra.mxu1 %v1169_v1 }
 0x462   :  { %725 = vmatpush.msra.mxu1 %v1189_v14 }
 0x464   :  { %726 = vmatpush.msra.mxu1 %v1195_v15 }
 0x466   :  { %727 = vmatpush.msra.mxu1 %v1201_v16 }
 0x468   :  { %728 = vmatpush.msra.mxu1 %v1212_v18 }
 0x46a   :  { %729 = vmatpush.msra.mxu1 %v1220_v19 }
 0x491   :  { %v377_v31 = vpop.permute.xlu2 %376 }
 0x492   :  { %379 = vst.msk [vmem:[#allocation3 + $0x8] sm:$0xff] %vm140_vm1, %v377_v31 }
 0x499   :  { %v287_v32 = vpop.permute.xlu2 %286  ;;  %v420_v34 = vld [vmem:[#allocation3 + $0x8] sm:$0xff] }
 0x49a   :  { %289 = vst.msk [vmem:[#allocation3 + $0x20] sm:$0xff] %vm140_vm1, %v287_v32  ;;  %437 = vrot.lane.b32.xlu0 %v420_v34, %s912_s13 }
 0x4a1   :  { %v227_v35 = vpop.permute.xlu2 %226  ;;  %v423_v50 = vld [vmem:[#allocation3 + $0x20] sm:$0xff] }
 0x4a2   :  { %229 = vst.msk [vmem:[#allocation3 + $0x30] sm:$0xff] %vm140_vm1, %v227_v35 }
 0x4a9   :  { %v425_v51 = vld [vmem:[#allocation3 + $0x30] sm:$0xff]  ;;  %v440_v59 = vpop.permute.xlu2 %439 }
 0x4aa   :  { %v461_v62 = vsel %vm140_vm1, %v413_v61, %v440_v59 }
 0x4ba   :  { %v399_v39 = vpop.f32.mrf.mxu3 }
 0x4bb   :  { %v402_v40 = vadd.f32 %v399_v39, %v158_v38 }
 0x4bd   :  { %864 = vtanh.f32 %v402_v40 }
 0x4c3   :  { %v865_v41 = vpop.eup %864 }
 0x4c4   :  { %404 = vst.msk [vmem:[#allocation2 + $0x38] sm:$0xff] %vm140_vm1, %v865_v41  ;;  %406 = vrot.lane.b32.xlu1 %v865_v41, %s913_s0 }
 0x4c5   :  { %410 = vst.msk [vmem:[%s1334_s7] sm:$0xff] %vm168_vm0, %v865_v41 }
 0x4c8   :  { %v581_v46 = vpop.f32.mrf.mxu1 }
 0x4cb   :  { %v418_v25 = vld [vmem:[#allocation2 + $0x38] sm:$0xff] }
 0x4cc   :  { %316 = vrot.lane.b32.xlu1 %v859_v8, %s913_s0  ;;  %v446_v8 = vpop.permute.xlu2 %445 }
 0x4cd   :  { %v464_v10 = vsel %vm140_vm1, %v416_v9, %v446_v8 }
 0x50c   :  { %v438_v56 = vpop.permute.xlu0 %437 }
 0x536   :  { %v407_v44 = vpop.permute.xlu1 %406 }
 0x537   :  { %409 = vst.msk [vmem:[#allocation3] sm:$0xff] %vm140_vm1, %v407_v44 }
 0x53e   :  { %v317_v47 = vpop.permute.xlu1 %316  ;;  %v419_v48 = vld [vmem:[#allocation3] sm:$0xff] }
 0x53f   :  { %319 = vst.msk [vmem:[#allocation3 + $0x18] sm:$0xff] %vm140_vm1, %v317_v47  ;;  %435 = vrot.lane.b32.xlu1 %v419_v48, %s912_s13 }
 0x546   :  { %v422_v49 = vld [vmem:[#allocation3 + $0x18] sm:$0xff] }
 0x547   :  { %196 = vrot.lane.b32.xlu1 %v1071_v33, %s913_s0  ;;  %441 = vrot.lane.b32.xlu0 %v422_v49, %s912_s13  ;;  %v460_v33 = vsel %vm140_vm1, %v412_v58, %v438_v56 }
 0x54f   :  { %443 = vrot.lane.b32.xlu1 %v423_v50, %s912_s13  ;;  %447 = vrot.lane.b32.xlu0 %v425_v51, %s912_s13 }
 0x5b1   :  { %v436_v54 = vpop.permute.xlu1 %435 }
 0x5b2   :  { %v459_v55 = vsel %vm140_vm1, %v411_v53, %v436_v54 }
 0x5b3   :  { %812 = vmatmul.msk.f32.vlgmr.msrb.gmra.mxu0 %vm168_vm0, %v459_v55 }
 0x5b9   :  { %v197_v57 = vpop.permute.xlu1 %196  ;;  %v442_v2 = vpop.permute.xlu0 %441 }
 0x5ba   :  { %199 = vst.msk [vmem:[#allocation3 + $0x38] sm:$0xff] %vm140_vm1, %v197_v57  ;;  %v462_v4 = vsel %vm140_vm1, %v414_v3, %v442_v2 }
 0x5bb   :  { %813 = vmatmul.msk.f32.gmra.mxu0 %vm168_vm0, %v460_v33 }
 0x5c1   :  { %v426_v60 = vld [vmem:[#allocation3 + $0x38] sm:$0xff]  ;;  %v444_v5 = vpop.permute.xlu1 %443  ;;  %v448_v11 = vpop.permute.xlu0 %447 }
 0x5c2   :  { %449 = vrot.lane.b32.xlu1 %v426_v60, %s912_s13  ;;  %v463_v7 = vsel %vm140_vm1, %v415_v6, %v444_v5  ;;  %v465_v13 = vsel %vm140_vm1, %v417_v12, %v448_v11 }
 0x5c3   :  { %814 = vmatmul.msk.f32.gmra.mxu0 %vm168_vm0, %v461_v62 }
 0x5cb   :  { %815 = vmatmul.msk.f32.gmra.mxu0 %vm168_vm0, %v462_v4 }
 0x5d3   :  { %816 = vmatmul.msk.f32.gmra.mxu0 %vm168_vm0, %v463_v7 }
 0x5db   :  { %817 = vmatmul.msk.f32.gmra.mxu0 %vm168_vm0, %v464_v10 }
 0x5e3   :  { %818 = vmatmul.msk.f32.gmra.mxu0 %vm168_vm0, %v465_v13 }
 0x630   :  { %v518_v21 = vpop.f32.mrf.mxu0 }
 0x631   :  { %v519_v44 = vadd.f32 %v849_v30, %v518_v21 }
 0x634   :  { %v450_v22 = vpop.permute.xlu1 %449 }
 0x635   :  { %v466_v26 = vsel %vm140_vm1, %v418_v25, %v450_v22 }
 0x636   :  { %819 = vmatmul.msk.f32.gmra.mxu0 %vm168_vm0, %v466_v26 }
 0x638   :  { %v521_v27 = vpop.f32.mrf.mxu0 }
 0x639   :  { %v522_v23 = vadd.f32 %v849_v30, %v521_v27 }
 0x640   :  { %v524_v28 = vpop.f32.mrf.mxu0 }
 0x641   :  { %v525_v38 = vadd.f32 %v849_v30, %v524_v28 }
 0x648   :  { %v527_v29 = vpop.f32.mrf.mxu0 }
 0x649   :  { %v528_v32 = vadd.f32 %v849_v30, %v527_v29 }
 0x650   :  { %v530_v31 = vpop.f32.mrf.mxu0 }
 0x651   :  { %v531_v34 = vadd.f32 %v849_v30, %v530_v31 }
 0x653   :  { %v545_v35 = vsel %vm140_vm1, %v528_v32, %v531_v34  ;;  %v546_v36 = vsel %vm140_vm1, %v531_v34, %v528_v32 }
 0x658   :  { %v533_v37 = vpop.f32.mrf.mxu0 }
 0x659   :  { %v534_v39 = vadd.f32 %v849_v30, %v533_v37 }
 0x65b   :  { %v544_v40 = vsel %vm140_vm1, %v525_v38, %v534_v39  ;;  %v547_v41 = vsel %vm140_vm1, %v534_v39, %v525_v38 }
 0x660   :  { %v536_v17 = vpop.f32.mrf.mxu0 }
 0x661   :  { %v537_v42 = vadd.f32 %v849_v30, %v536_v17 }
 0x663   :  { %v548_v24 = vsel %vm140_vm1, %v537_v42, %v522_v23  ;;  %v543_v51 = vsel %vm140_vm1, %v522_v23, %v537_v42 }
 0x6b3   :  { %v539_v43 = vpop.f32.mrf.mxu0 }
 0x6b4   :  { %v540_v45 = vadd.f32 %v849_v30, %v539_v43 }
 0x6b6   :  { %v542_v47 = vsel %vm140_vm1, %v519_v44, %v540_v45  ;;  %v549_v48 = vsel %vm140_vm1, %v540_v45, %v519_v44 }
 0x6b7   :  { %v584_v49 = vadd.f32 %v581_v46, %v542_v47 }
 0x6b9   :  { %866 = vtanh.f32 %v584_v49 }
 0x6bf   :  { %v1274_v50 = vpop.eup %866 }
 0x6c0   :  { %830 = vmatmul.msk.f32.vlgmr.msra.gmra.mxu2 %vm168_vm0, %v1274_v50 }
 0x6c1   :  { %747 = vmatpush.msra.mxu2 %v1157_v63 }
 0x6c3   :  { %748 = vmatpush.msra.mxu2 %v1162_v0 }
 0x6c5   :  { %749 = vmatpush.msra.mxu2 %v1169_v1 }
 0x6c7   :  { %750 = vmatpush.msra.mxu2 %v1189_v14 }
 0x6c9   :  { %751 = vmatpush.msra.mxu2 %v1195_v15 }
 0x6cb   :  { %752 = vmatpush.msra.mxu2 %v1201_v16 }
 0x6cd   :  { %753 = vmatpush.msra.mxu2 %v1212_v18 }
 0x6cf   :  { %754 = vmatpush.msra.mxu2 %v1220_v19 }
 0x743   :  { %v606_v52 = vpop.f32.mrf.mxu2 }
 0x744   :  { %v609_v53 = vadd.f32 %v606_v52, %v543_v51 }
 0x746   :  { %868 = vtanh.f32 %v609_v53 }
 0x74c   :  { %v869_v54 = vpop.eup %868 }
 0x74d   :  { %831 = vmatmul.msk.f32.vlgmr.msrb.gmra.mxu3 %vm168_vm0, %v869_v54 }
 0x7d0   :  { %v631_v55 = vpop.f32.mrf.mxu3 }
 0x7d1   :  { %v634_v56 = vadd.f32 %v631_v55, %v544_v40 }
 0x7d3   :  { %870 = vtanh.f32 %v634_v56 }
 0x7d9   :  { %v871_v57 = vpop.eup %870 }
 0x7da   :  { %832 = vmatmul.msk.f32.vlgmr.msrb.gmra.mxu1 %vm168_vm0, %v871_v57 }
 0x857   :  { %v656_v58 = vpop.f32.mrf.mxu1 }
 0x858   :  { %v659_v33 = vadd.f32 %v656_v58, %v545_v35 }
 0x85a   :  { %872 = vtanh.f32 %v659_v33 }
 0x860   :  { %v873_v59 = vpop.eup %872 }
 0x861   :  { %833 = vmatmul.msk.f32.vlgmr.msrb.gmra.mxu2 %vm168_vm0, %v873_v59 }
 0x8e4   :  { %v681_v60 = vpop.f32.mrf.mxu2 }
 0x8e5   :  { %v684_v61 = vadd.f32 %v681_v60, %v546_v36 }
 0x8e7   :  { %874 = vtanh.f32 %v684_v61 }
 0x8ed   :  { %v875_v62 = vpop.eup %874 }
 0x8ee   :  { %834 = vmatmul.msk.f32.vlgmr.msra.gmra.mxu3 %vm168_vm0, %v875_v62  ;;  %v766_v63 = vsel %vm140_vm1, %v873_v59, %v875_v62  ;;  %v767_v7 = vsel %vm140_vm1, %v875_v62, %v873_v59 }
 0x8ef   :  { %776 = vrot.lane.b32.xlu0 %v766_v63, %s914_s4 }
 0x961   :  { %v777_v3 = vpop.permute.xlu0 %776 }
 0x971   :  { %v706_v0 = vpop.f32.mrf.mxu3 }
 0x972   :  { %v709_v1 = vadd.f32 %v706_v0, %v547_v41 }
 0x974   :  { %876 = vtanh.f32 %v709_v1 }
 0x97a   :  { %v877_v2 = vpop.eup %876 }
 0x97b   :  { %v765_v4 = vsel %vm140_vm1, %v871_v57, %v877_v2  ;;  %835 = vmatmul.msk.f32.vlgmr.msra.gmra.mxu1 %vm168_vm0, %v877_v2  ;;  %v768_v5 = vsel %vm140_vm1, %v877_v2, %v871_v57 }
 0x97c   :  { %v788_v6 = vsel %vm168_vm0, %v765_v4, %v777_v3  ;;  %780 = vrot.lane.b32.xlu1 %v768_v5, %s914_s4 }
 0x97d   :  { %792 = vst [vmem:[%s1333_s6 + $0x8] sm:$0xff] %v788_v6 }
 0x9ee   :  { %v781_v8 = vpop.permute.xlu1 %780 }
 0x9ef   :  { %v789_v9 = vsel %vm168_vm0, %v767_v7, %v781_v8 }
 0x9f0   :  { %793 = vst [vmem:[%s1333_s6 + $0x10] sm:$0xff] %v789_v9 }
 0x9f8   :  { %v731_v10 = vpop.f32.mrf.mxu1 }
 0x9f9   :  { %v734_v11 = vadd.f32 %v731_v10, %v548_v24 }
 0x9fb   :  { %878 = vtanh.f32 %v734_v11 }
 0xa01   :  { %v879_v12 = vpop.eup %878 }
 0xa02   :  { %836 = vmatmul.msk.f32.vlgmr.msra.gmra.mxu2 %vm168_vm0, %v879_v12  ;;  %v764_v13 = vsel %vm140_vm1, %v869_v54, %v879_v12  ;;  %v769_v22 = vsel %vm140_vm1, %v879_v12, %v869_v54 }
 0xa03   :  { %772 = vrot.lane.b32.xlu2 %v764_v13, %s914_s4 }
 0xa5d   :  { %v773_v18 = vpop.permute.xlu2 %772 }
 0xa85   :  { %v756_v14 = vpop.f32.mrf.mxu2 }
 0xa86   :  { %v759_v15 = vadd.f32 %v756_v14, %v549_v48 }
 0xa88   :  { %880 = vtanh.f32 %v759_v15 }
 0xa8e   :  { %v881_v16 = vpop.eup %880 }
 0xa8f   :  { %837 = vst.msk [vmem:[%s1334_s7 + $0x8] sm:$0xff] %vm168_vm0, %v881_v16  ;;  %v763_v19 = vsel %vm140_vm1, %v1274_v50, %v881_v16  ;;  %v770_v20 = vsel %vm140_vm1, %v881_v16, %v1274_v50 }
 0xa90   :  { %v787_v21 = vsel %vm168_vm0, %v763_v19, %v773_v18  ;;  %784 = vrot.lane.b32.xlu2 %v770_v20, %s914_s4 }
 0xa91   :  { %791 = vst [vmem:[%s1333_s6] sm:$0xff] %v787_v21 }
 0xaea   :  { %v785_v25 = vpop.permute.xlu2 %784 }
 0xaeb   :  { %v790_v26 = vsel %vm168_vm0, %v769_v22, %v785_v25 }
 0xaec   :  { %794 = vst [vmem:[%s1333_s6 + $0x18] sm:$0xff] %v790_v26 }
 0xaed   :  { %803 = vsyncpa [#allocation5], 1 }

</bundles_post_ra>
